<compile_context>
chip_gen: v5e
topology: v5e:2x2
jax: 0.10.0
libtpu: 0.0.40
codegen_flags: <defaults>
</compile_context>

<pallas_src>
import numpy as np

import jax
import jax.numpy as jnp
from jax.experimental import pallas as pl
from jax.experimental.pallas import tpu as pltpu


# Conservative VMEM budget: fits v7x (64 MiB physical) with headroom and is far
# below v5e/v6e's 128 MiB; also used as the explicit scoped-VMEM limit.
_VMEM_BUDGET = 48 * 1024 * 1024


def _relative_position_index(win_size: int) -> np.ndarray:
    """Same construction as LearnedPosMap.rel_locl_init (numpy, host-side glue)."""
    h = w = win_size
    coords = np.stack(np.meshgrid(np.arange(h), np.arange(w), indexing="ij"))
    coords_flatten = coords.reshape(2, -1)                       # (2, N)
    rel = coords_flatten[:, :, None] - coords_flatten[:, None, :]
    rel = rel.transpose(1, 2, 0).copy()                          # (N, N, 2)
    rel[:, :, 0] += h - 1
    rel[:, :, 1] += w - 1
    rel[:, :, 0] *= 2 * w - 1
    return rel.sum(-1)                                           # (N, N) int


def build_posgu_params(bias_table, token_proj_n_bias, win_size, gamma, dim, chunks=2):
    """Expand LearnedPosMap parameters into the kernel-resident weight/bias.

    Depends only on parameters and static shapes -> build ONCE per module
    (hoisted out of the per-step forward), not on every forward call.

    Returns:
      w_big:    (N*gate_dim, N*gate_dim) bf16, channel-block-structured weight
                over the *u half only*:
                    w_big[n*G + c, m*G + c] = posmap[c % gamma, m, n]
      bias_row: (1, N*gate_dim) f32, token_proj_n_bias broadcast over channels.
    """
    assert chunks in (1, 2)
    N = win_size * win_size
    gate_dim = dim if chunks == 1 else dim // chunks
    assert gate_dim % gamma == 0

    idx = jnp.asarray(_relative_position_index(win_size).reshape(-1))
    posmap = bias_table[idx].reshape(N, N, gamma).transpose(2, 0, 1)     # (gamma, m, n)

    g_of_c = jnp.arange(gate_dim) % gamma            # channel c = v*gamma + g -> g = c % gamma
    p_c = posmap[g_of_c]                             # (gate_dim, m, n)
    eye = jnp.eye(gate_dim, dtype=jnp.float32)
    # w[n, c_in, m, c_out] = posmap[c_out % gamma, m, n] * (c_in == c_out)
    w = p_c.transpose(2, 1, 0)[:, None, :, :] * eye[None, :, None, :]    # (N, G, N, G)
    w_big = w.reshape(N * gate_dim, N * gate_dim).astype(jnp.bfloat16)   # bf16 MXU operand
    # TODO(synk): this expanded weight is ~1/gate_dim dense and scales as
    # (N*gate_dim)^2; for production window sizes switch to the
    # gamma-block-diagonal (gamma*N x gamma*N) weight over a (BW*V, gamma*N)
    # operand layout (selected by a size threshold) so the MXU only does useful
    # MACs and the weight fits v7x's 64 MiB VMEM.

    bias_row = jnp.broadcast_to(
        token_proj_n_bias.reshape(N, 1).astype(jnp.float32),
        (N, gate_dim)).reshape(1, N * gate_dim)
    return w_big, bias_row


def _posgu_kernel(u_ref, v_ref, w_ref, b_ref, o_ref):
    """chunks == 2 path: u/v already split, lane-dense.

    u_ref: (T, N*G) bf16   v_ref: (T, N*G) x.dtype
    w_ref: (N*G, N*G) bf16 b_ref: (1, N*G) f32     o_ref: (T, N*G) x.dtype
    """
    u = u_ref[...].astype(jnp.bfloat16)                              # bf16 MXU operand
    acc = jnp.dot(u, w_ref[...], preferred_element_type=jnp.float32)
    acc = acc + b_ref[...]                                           # + token_proj_n_bias[m]
    o_ref[...] = (acc * v_ref[...].astype(jnp.float32)).astype(o_ref.dtype)


def _posgu_kernel_shared(x_ref, w_ref, b_ref, o_ref):
    """chunks == 1 path: u == v == x, a single lane-dense tile."""
    x = x_ref[...]
    acc = jnp.dot(x.astype(jnp.bfloat16), w_ref[...],
                  preferred_element_type=jnp.float32)
    acc = acc + b_ref[...]
    o_ref[...] = (acc * x.astype(jnp.float32)).astype(o_ref.dtype)


def _pick_tile_rows(bw, ng, tile_itemsizes, windows_per_step):
    """Window-tile rows: VMEM-budgeted, sublane-packed, >= 2 grid steps if possible."""
    smallest = min(tile_itemsizes)
    if smallest >= 4:
        row_mult = 8
    elif smallest == 2:
        row_mult = 16          # bf16 packs two rows per sublane
    else:
        row_mult = 32          # int8/fp8
    # Per window-row VMEM, double-buffered by the pipeline (inputs + output).
    per_row = 2 * sum(ng * s for s in tile_itemsizes)
    # Weight (bf16) + bias (f32); double-buffered by default even though their
    # block index is constant.
    # TODO(synk): single-buffer the loop-invariant weight/bias (Buffered(1) or a
    # one-shot scratch DMA) once the weight is large enough for it to matter.
    fixed = 2 * (ng * ng * 2 + ng * 4)
    cap = max(row_mult, (_VMEM_BUDGET - fixed) // max(per_row, 1))
    tbw = min(windows_per_step, cap, bw)
    if bw > row_mult:
        # Guarantee >= 2 grid steps so both v7x TensorCores get work on the
        # "parallel" windows axis.
        tbw = min(tbw, -(-bw // 2))
    tbw = max(row_mult, (tbw // row_mult) * row_mult)
    return min(tbw, bw)


def posgu_apply(x, w_big, bias_row, *, chunks=2, windows_per_step=512):
    """PoSGU.forward with pos_only=True, given pre-built (hoisted) weights."""
    assert chunks in (1, 2)
    B, W, N, C = x.shape
    gate_dim = C if chunks == 1 else C // chunks
    NG = N * gate_dim
    assert w_big.shape == (NG, NG)
    assert bias_row.shape == (1, NG)
    # Lane-dense / unmasked-store assumption the kernel's perf story relies on.
    assert NG % 128 == 0, "N*gate_dim must be a multiple of 128"

    BW = B * W
    out_dtype = x.dtype

    if chunks == 1:
        # u == v == x: pass the tile once (no duplicate HBM fetch), cast in-kernel.
        x2 = x.reshape(BW, NG)
        tile_isz = (x2.dtype.itemsize, out_dtype.itemsize)
        tbw = _pick_tile_rows(BW, NG, tile_isz, windows_per_step)
        kern = _posgu_kernel_shared
        inputs = (x2, w_big, bias_row)
        data_specs = [pl.BlockSpec((tbw, NG), lambda i: (i, 0))]
    else:
        # u/v split done ONCE here; u is materialized directly in bf16 (fused
        # with the split) so its DMA and the MXU operand are already half-width.
        u2 = x[..., :gate_dim].reshape(BW, NG).astype(jnp.bfloat16)
        v2 = x[..., gate_dim:].reshape(BW, NG)
        tile_isz = (2, v2.dtype.itemsize, out_dtype.itemsize)
        tbw = _pick_tile_rows(BW, NG, tile_isz, windows_per_step)
        kern = _posgu_kernel
        inputs = (u2, v2, w_big, bias_row)
        data_specs = [pl.BlockSpec((tbw, NG), lambda i: (i, 0)),
                      pl.BlockSpec((tbw, NG), lambda i: (i, 0))]

    in_specs = data_specs + [
        pl.BlockSpec((NG, NG), lambda i: (0, 0)),   # weight, resident (constant index)
        pl.BlockSpec((1, NG), lambda i: (0, 0)),    # bias row, resident
    ]
    grid = (pl.cdiv(BW, tbw),)

    flops = 2 * BW * N * N * gate_dim                       # useful FLOPs
    bytes_accessed = int(
        sum(int(np.prod(a.shape)) * a.dtype.itemsize for a in inputs)
        + BW * NG * out_dtype.itemsize)

    out2 = pl.pallas_call(
        kern,
        out_shape=jax.ShapeDtypeStruct((BW, NG), out_dtype),
        grid_spec=pltpu.PrefetchScalarGridSpec(
            num_scalar_prefetch=0,
            grid=grid,
            in_specs=in_specs,
            out_specs=pl.BlockSpec((tbw, NG), lambda i: (i, 0)),
        ),
        compiler_params=pltpu.CompilerParams(
            dimension_semantics=("parallel",),      # shard windows across TCs (v7x)
            vmem_limit_bytes=_VMEM_BUDGET),
        cost_estimate=pl.CostEstimate(flops=flops, transcendentals=0,
                                      bytes_accessed=bytes_accessed),
    )(*inputs)

    # Free reshape back to 'b w n (v s)'.
    return out2.reshape(B, W, N, gate_dim)


def posgu_forward(x, bias_table, token_proj_n_bias, win_size, gamma, chunks=2,
                  windows_per_step=512):
    """Convenience wrapper. Prefer build_posgu_params() once + posgu_apply() per step."""
    w_big, bias_row = build_posgu_params(bias_table, token_proj_n_bias,
                                         win_size, gamma, x.shape[-1], chunks)
    return posgu_apply(x, w_big, bias_row, chunks=chunks,
                       windows_per_step=windows_per_step)


if __name__ == "__main__":
    key = jax.random.PRNGKey(0)
    k1, k2, k3 = jax.random.split(key, 3)

    # Small shapes consistent with the module: dim divisible by chunks,
    # gate_dim divisible by gamma, N = win_size**2; BW=32 so the windows axis
    # actually tiles into 2 grid steps of 16 rows.
    B, W, win_size, dim, gamma, chunks = 2, 16, 4, 64, 16, 2
    N = win_size * win_size
    gate_dim = dim // chunks
    V = gate_dim // gamma

    x = jax.random.normal(k1, (B, W, N, dim), dtype=jnp.float32)
    # The PyTorch module initializes these parameters to zeros (its trunc_normal_
    # re-init never triggers); use small random values so the test is non-trivial.
    bias_table = 0.02 * jax.random.normal(
        k2, ((2 * win_size - 1) * (2 * win_size - 1), gamma), dtype=jnp.float32)
    token_proj_n_bias = 0.02 * jax.random.normal(k3, (1, N, 1), dtype=jnp.float32)

    # Parameter expansion hoisted out of the forward (build once per module).
    w_big, bias_row = build_posgu_params(bias_table, token_proj_n_bias,
                                         win_size, gamma, dim, chunks)
    w_big, bias_row = jax.block_until_ready((w_big, bias_row))

    out = posgu_apply(x, w_big, bias_row, chunks=chunks, windows_per_step=512)
    out = jax.block_until_ready(out)

    # ---- references mirroring the PyTorch einsum semantics ----
    idx = _relative_position_index(win_size).reshape(-1)
    posmap_ref = bias_table[jnp.asarray(idx)].reshape(N, N, gamma).transpose(2, 0, 1)
    u_h = x[..., :gate_dim]
    v_h = x[..., gate_dim:]

    def reference(posmap_op, u_op):
        u5 = u_op.reshape(B, W, N, V, gamma)
        r = jnp.einsum("smn,bwnvs->bwmvs", posmap_op, u5,
                       precision=jax.lax.Precision.HIGHEST)
        r = r + token_proj_n_bias.reshape(1, 1, N, 1, 1)
        return r.reshape(B, W, N, gate_dim) * v_h

    # (a) tight check against a reference emulating the kernel's bf16 operands /
    #     f32 accumulation (only accumulation-order differences remain).
    ref_bf16 = reference(posmap_ref.astype(jnp.bfloat16).astype(jnp.float32),
                         u_h.astype(jnp.bfloat16).astype(jnp.float32))
    np.testing.assert_allclose(np.asarray(out), np.asarray(ref_bf16),
                               rtol=1e-4, atol=1e-4)

    # (b) looser check against the true f32 module semantics (bf16 MXU operands
    #     cost ~3 decimal digits, per the perf review).
    ref_f32 = reference(posmap_ref, u_h)
    np.testing.assert_allclose(np.asarray(out), np.asarray(ref_f32),
                               rtol=2e-2, atol=1e-2)

    print("KERNEL_OK")
</pallas_src>

<mosaic_0001>
module attributes {stable_mosaic.version = 11 : i64} {
  func.func @_posgu_kernel(%arg0: i32, %arg1: memref<16x512xbf16, #tpu.memory_space<vmem>>, %arg2: memref<16x512xf32, #tpu.memory_space<vmem>>, %arg3: memref<512x512xbf16, #tpu.memory_space<vmem>>, %arg4: memref<1x512xf32, #tpu.memory_space<vmem>>, %arg5: memref<16x512xf32, #tpu.memory_space<vmem>>) attributes {dimension_semantics = [#tpu.dimension_semantics<parallel>], iteration_bounds = array<i64: 2>, scalar_prefetch = 0 : i64, scratch_operands = 0 : i64, tpu.core_type = #tpu.core_type<tc>, window_params = [{transform_indices = @transform_0, window_bounds = array<i64: 16, 512>}, {transform_indices = @transform_1, window_bounds = array<i64: 16, 512>}, {pipeline_mode = #tpu.pipeline_mode<synchronous>, transform_indices = @transform_2, window_bounds = array<i64: 512, 512>}, {pipeline_mode = #tpu.pipeline_mode<synchronous>, transform_indices = @transform_3, window_bounds = array<i64: 1, 512>}, {transform_indices = @transform_4, window_bounds = array<i64: 16, 512>}]} {
    %c0 = arith.constant 0 : index
    %c0_0 = arith.constant 0 : index
    %0 = vector.load %arg1[%c0, %c0_0] : memref<16x512xbf16, #tpu.memory_space<vmem>>, vector<16x512xbf16>
    %c0_1 = arith.constant 0 : index
    %c0_2 = arith.constant 0 : index
    %1 = vector.load %arg3[%c0_1, %c0_2] : memref<512x512xbf16, #tpu.memory_space<vmem>>, vector<512x512xbf16>
    %cst = arith.constant dense<0.000000e+00> : vector<16x512xf32>
    %2 = tpu.matmul %0, %1, %cst {dimension_numbers = #tpu.dot_dimension_numbers<[1], [0], [0], [1], [0, 0, 1, 1], [], []>} : vector<16x512xbf16>, vector<512x512xbf16>, vector<16x512xf32> -> vector<16x512xf32>
    %c0_3 = arith.constant 0 : index
    %c0_4 = arith.constant 0 : index
    %3 = vector.load %arg4[%c0_3, %c0_4] : memref<1x512xf32, #tpu.memory_space<vmem>>, vector<1x512xf32>
    %4 = vector.broadcast %3 : vector<1x512xf32> to vector<16x512xf32>
    %5 = arith.addf %2, %4 : vector<16x512xf32>
    %c0_5 = arith.constant 0 : index
    %c0_6 = arith.constant 0 : index
    %6 = vector.load %arg2[%c0_5, %c0_6] : memref<16x512xf32, #tpu.memory_space<vmem>>, vector<16x512xf32>
    %7 = arith.mulf %5, %6 : vector<16x512xf32>
    %c0_7 = arith.constant 0 : index
    %c0_8 = arith.constant 0 : index
    %8 = vector.load %arg5[%c0_7, %c0_8] : memref<16x512xf32, #tpu.memory_space<vmem>>, vector<16x512xf32>
    tpu.vector_store %arg5[%c0_7, %c0_8], %7 {strides = array<i32>} : memref<16x512xf32, #tpu.memory_space<vmem>>, vector<16x512xf32>,
    return
  }
  func.func @transform_0(%arg0: i32) -> (i32, i32) {
    %c0_i32 = arith.constant 0 : i32
    %c0_i32_0 = arith.constant 0 : i32
    return %arg0, %c0_i32 : i32, i32
  }
  func.func @transform_1(%arg0: i32) -> (i32, i32) {
    %c0_i32 = arith.constant 0 : i32
    %c0_i32_0 = arith.constant 0 : i32
    return %arg0, %c0_i32 : i32, i32
  }
  func.func @transform_2(%arg0: i32) -> (i32, i32) {
    %c0_i32 = arith.constant 0 : i32
    %c0_i32_0 = arith.constant 0 : i32
    %c0_i32_1 = arith.constant 0 : i32
    return %c0_i32, %c0_i32_0 : i32, i32
  }
  func.func @transform_3(%arg0: i32) -> (i32, i32) {
    %c0_i32 = arith.constant 0 : i32
    %c0_i32_0 = arith.constant 0 : i32
    %c0_i32_1 = arith.constant 0 : i32
    return %c0_i32, %c0_i32_0 : i32, i32
  }
  func.func @transform_4(%arg0: i32) -> (i32, i32) {
    %c0_i32 = arith.constant 0 : i32
    %c0_i32_0 = arith.constant 0 : i32
    return %arg0, %c0_i32 : i32, i32
  }
}

</mosaic_0001>

<bundles_post_ra>
// kernel: tpu_custom_call.1
= control target key start
LH: loop header
LB: loop body
LE: loop exit
PB: predicated region body
PF: predicated region fallthrough
CT: control target
= control target key end

     0   :  { %s2726_s0 = inlined_call_operand.hbm [shape: bf16[32,512], index: 0, kind: input, shape index: {}]   ;;  %s2727_s1 = inlined_call_operand.hbm [shape: f32[32,512], index: 1, kind: input, shape index: {}]   ;;  %s2728_s2 = inlined_call_operand.hbm [shape: bf16[512,512], index: 2, kind: input, shape index: {}]   ;;  %s2729_s3 = inlined_call_operand.hbm [shape: f32[1,512], index: 3, kind: input, shape index: {}]   ;;  %s2730_s4 = inlined_call_operand.hbm [shape: f32[32,512], index: 4, kind: output, shape index: {}]  }
   0x1   :  { %2733 = sst [smem:[#allocation17_spill]] %s2728_s2 }
   0x2   :  { %2734 = sst [smem:[#allocation18_spill]] %s2729_s3 }
   0x3   :  { %9 = vsyncpa [#allocation3], 0 }
   0x4   :  { %11 = vsyncpa [#allocation3 + $0x1], 0 }
   0x5   :  { %12 = vsyncpa [#allocation6], 0 }
   0x6   :  { %14 = vsyncpa [#allocation6 + $0x1], 0 }
   0x7   :  { %15 = vsyncpa [#allocation9], 0 }
   0x8   :  { %16 = vsyncpa [#allocation4], 0 }
   0x9   :  { %18 = vsyncpa [#allocation4 + $0x1], 0  ;;  %s2480_s15 = smov 0   ;;  %s2482_s16 = smov 0  }
   0xa   :  { %s2484_s17 = smov 0   ;;  %s2486_s18 = smov 0  }
   0xb LB: > { %s2501_s19 = sadd.s32 4294967295, %s2445_s18   ;;  %s1478_s20 = sadd.s32 4294967294, %s2445_s18   ;;  %s2445_s18 = sphi %s2486_s18, %s2750_s18   ;;  %s2441_s17 = sphi %s2484_s17, %s2749_s17   ;;  %s2437_s16 = sphi %s2482_s16, %s2748_s16   ;;  %s2433_s15 = sphi %s2480_s15, %s2747_s15  }
   0xc   : > { %p44_p0 = scmp.ne.s32.totalorder %s2437_s16, %s2433_s15  ;;  %p45_p1 = scmp.eq.s32.totalorder %s2501_s19, 0 }
   0xd   : > { %p136_p2 = scmp.eq.s32.totalorder %s2501_s19, 1  ;;  %p142_p3 = scmp.eq.s32.totalorder %s1478_s20, 1 }
   0xe   : > { %p2510_p4 = por %p45_p1, %p44_p0  ;;  %p1479_p5 = scmp.ge.s32.totalorder %s2445_s18, 1 }
   0xf   : > { %p2515_p6 = por %p142_p3, %p44_p0  ;;  %p149_p7 = scmp.lt.s32.totalorder %s2445_s18, 3 }
  0x10   : > { %s2737_s2 = sld [smem:[#allocation17_spill]]  ;;  %s2447_s27 = smov [#allocation7]  }
  0x11   : > { %p2523_p8 = pnand %p1479_p5, %p149_p7  ;;  %s162_s28 = sshll.u32 %s2447_s27, 4  ;;  %s163_s28 = int_to_ptr.vmem [resolvable:$true] %s162_s28 }
  0x12   : > { %s2739_s3 = sld [smem:[#allocation18_spill]]  ;;  %s2731_s6 = smov 256  }
  0x13   : > { %p2183_p9 = pneg %p2523_p8  ;;  %s2732_s7 = smov 16  }
  0x14   : > { %s2450_s8 = smov [#allocation8]   ;;  %s2539_s10 = sadd.s32 1, %s2445_s18  }
  0x15   : > { %p2184_p10 = pnand %p2183_p9, %p45_p1  ;;  %s177_s9 = sshll.u32 %s2450_s8, 4  ;;  %s178_s9 = int_to_ptr.vmem [resolvable:$true] %s177_s9 }
  0x16   : > { %s160_s25 = sshll.u32 %s2737_s2, 4  ;;  %s31_s11 = sadd.s32 1, %s2441_s17  ;;  %s161_s25 = int_to_ptr.hbm [resolvable:$true] %s160_s25 }
  0x17   : > { %2186 = dma.hbm_to_vmem [thread:$0]  (!%p2184_p10), %s161_s25, 16384, %s163_s28, [#allocation6], %s2731_s6, %s2731_s6, %s2732_s7  }
  0x18   : > { %s175_s5 = sshll.u32 %s2739_s3, 4  ;;  %s28_s12 = ssub.s32 %s2445_s18, %s2539_s10  ;;  %s176_s5 = int_to_ptr.hbm [resolvable:$true] %s175_s5 }
  0x19   : > { %2189 = dma.hbm_to_vmem [thread:$0]  (!%p2184_p10), %s176_s5, 64, %s178_s9, [#allocation9]  }
  0x1a   : > { %p38_p12 = scmp.ne.s32.totalorder %s2441_s17, %s2437_s16  ;;  %p29_p13 = scmp.eq.s32.totalorder %s28_s12, 0 }
  0x1b   : > { %p39_p0 = scmp.eq.s32.totalorder %s2445_s18, 0  ;;  %p2203_p5 = scmp.lt.s32.totalorder %s2445_s18, 2 }
  0x1c   : > { %p2549_p3 = por %p136_p2, %p38_p12  ;;  %s2558_s20 = sand.u32 1, %s2441_s17  }
  0x1d   : > { %s2555_s14 = scalar_select %p29_p13, %s2441_s17, %s31_s11  }
  0x1e   : > { %p40_p7 = por %p39_p0, %p38_p12  ;;  %s1483_s23 = sshll.u32 %s2558_s20, 5 }
  0x1f   : > { %2741 = sst [smem:[#allocation16_spill]] %s2555_s14  ;;  %s2032_s24 = sshll.u32 %s2445_s18, 5 }
  0x20   : > { %s198_s28 = scalar_lea.hbm %s2726_s0, %s2032_s24  ;;  %s192_s29 = scalar_lea.vmem [#allocation2], %s1483_s23 }
  0x21   : > { %s201_s30 = sshll.u32 %s192_s29, 4  ;;  %s199_s5 = sshll.u32 %s198_s28, 4  ;;  %s202_s30 = int_to_ptr.vmem [resolvable:$true] %s201_s30  ;;  %s200_s5 = int_to_ptr.hbm [resolvable:$true] %s199_s5 }
  0x22   : > { %p2565_p2 = pnand %p2203_p5, %p40_p7  ;;  %s211_s9 = sand.u32 1, %s2445_s18  }
  0x23   : > { %s1487_s11 = sshll.u32 %s2558_s20, 6  ;;  %s189_s12 = scalar_lea.sflag [#allocation3], %s2558_s20 }
  0x24   : > { %s2307_s6 = sshra.s32 %s200_s5, 4  ;;  %p2311_p10 = pneg %p2565_p2  ;;  %s2308_s6 = int_to_ptr.hbm [resolvable:$true] %s2307_s6 }
  0x25   : > { %s2309_s7 = scalar_lea.hbm %s2308_s6, 32  ;;  %s2314_s25 = scalar_lea.hbm %s2726_s0, 64 }
  0x26   : > { %p2310_p9 = scmp.ne.s32.totalorder %s2308_s6, %s2309_s7  ;;  %p2315_p0 = scmp.lt.s32.totalorder %s2308_s6, %s2726_s0 }
  0x27   : > { %p2316_p5 = scmp.lt.s32.totalorder %s2314_s25, %s2309_s7 }
  0x28   : > { %p2312_p12 = pnand %p2311_p10, %p2310_p9 }
  0x29   : > { %p2317_p7 = por %p2316_p5, %p2315_p0 }
  0x2a   : > { %p2313_p13 = pneg %p2312_p12 }
  0x2c   : > { %p2318_p11 = pnand %p2317_p7, %p2313_p13 }
  0x2e   : > { %2321 = shalt.err (!%p2318_p11)
}
  0x2f   : > { %s2743_s20 = smov 16   ;;  %s2744_s29 = smov 256  }
  0x30   : > { %2193 = dma.hbm_to_vmem [thread:$0]  (!%p2565_p2), %s200_s5, 512, %s202_s30, %s189_s12, %s2744_s29, %s2744_s29, %s2743_s20  }
  0x31   : > { %s2034_s2 = sshll.u32 %s2445_s18, 6  ;;  %s215_s14 = scalar_lea.vmem [#allocation5], %s1487_s11 }
  0x32   : > { %s221_s24 = scalar_lea.hbm %s2727_s1, %s2034_s2  ;;  %s224_s27 = sshll.u32 %s215_s14, 4  ;;  %s225_s27 = int_to_ptr.vmem [resolvable:$true] %s224_s27 }
  0x33   : > { %s222_s6 = sshll.u32 %s221_s24, 4  ;;  %s212_s7 = scalar_lea.sflag [#allocation6], %s211_s9  ;;  %s223_s6 = int_to_ptr.hbm [resolvable:$true] %s222_s6 }
  0x34   : > { %s2337_s25 = sshra.s32 %s223_s6, 4  ;;  %s2344_s12 = scalar_lea.hbm %s2727_s1, 128  ;;  %s2338_s25 = int_to_ptr.hbm [resolvable:$true] %s2337_s25 }
  0x35   : > { %s2339_s28 = scalar_lea.hbm %s2338_s25, 64  ;;  %p2345_p13 = scmp.lt.s32.totalorder %s2338_s25, %s2727_s1 }
  0x36   : > { %p2340_p11 = scmp.ne.s32.totalorder %s2338_s25, %s2339_s28  ;;  %p2346_p0 = scmp.lt.s32.totalorder %s2344_s12, %s2339_s28 }
  0x38   : > { %p2342_p9 = pnand %p2340_p11, %p2311_p10  ;;  %p2347_p5 = por %p2346_p0, %p2345_p13 }
  0x3a   : > { %p2343_p12 = pneg %p2342_p9 }
  0x3c   : > { %p2348_p7 = pnand %p2347_p5, %p2343_p12 }
  0x3e   : > { %2351 = shalt.err (!%p2348_p7)
}
  0x3f   : > { %s2451_s14 = smov 512   ;;  %s2452_s9 = smov 32  }
  0x40   : > { %2196 = dma.hbm_to_vmem [thread:$0]  (!%p2565_p2), %s223_s6, 1024, %s225_s27, %s212_s7, %s2451_s14, %s2451_s14, %s2452_s9  }
  0x41   : > { %236 = sbr.rel (%p2523_p8) target bundleno = 360 (0x168), region = 36  ;;  %s2606_s11 = sand.u32 (!%p2523_p8), 1, %s2437_s16  }
  0x42   : > { %s1492_s20 = sshll.u32 (!%p2523_p8), %s2606_s11, 5  ;;  %s239_s29 = scalar_lea.sflag (!%p2523_p8), [#allocation3], %s2606_s11 }
  0x43   : > { %s2610_s23 = scalar_lea.vmem (!%p2523_p8), [#allocation2], %s1492_s20 }
  0x46   : > { %2412 = dma.done.wait (%p2510_p4), %s239_s29, 512  }
  0x47   : > { %2414 = vsyncadd (%p2510_p4), %s239_s29, 4294966784  ;;  %s248_s26 = sand.u32 1, %s2501_s19   ;;  %s1493_s8 = sshll.u32 %s2606_s11, 6 }
  0x48   : > { %s249_s24 = scalar_lea.sflag [#allocation6], %s248_s26  ;;  %s2620_s27 = scalar_lea.vmem [#allocation5], %s1493_s8 }
  0x49   : > { %2416 = dma.done.wait (%p2510_p4), %s249_s24, 1024  }
  0x4a   : > { %2418 = vsyncadd (%p2510_p4), %s249_s24, 4294966272 }
  0x4b   : > { %2420 = dma.done.wait (%p45_p1), [#allocation6], 16384  }
  0x4c   : > { %2422 = vsyncadd (%p45_p1), [#allocation6], 4294950912 }
  0x4d   : > { %2424 = dma.done.wait (%p45_p1), [#allocation9], 64  }
  0x4e   : > { %2426 = vsyncadd (%p45_p1), [#allocation9], 4294967232  ;;  %v1627_v0 = vld [vmem:[#allocation7 + $0xe0] sm:$0xf]  ;;  %v2069_v1 = vld [vmem:[#allocation7 + $0xec] sm:$0xf0] }
  0x4f   : > { %v1755_v2 = vld [vmem:[#allocation7 + $0x1e0] sm:$0xf]  ;;  %v1628_v3 = vor.u32 %v2069_v1, %v1627_v0  ;;  %v2101_v4 = vld [vmem:[#allocation7 + $0x1ec] sm:$0xf0]  ;;  %s2672_s21 = scalar_lea.vmem [#allocation10], %s1493_s8  ;;  %s2168_s6 = sshll.u32 %s2501_s19, 6 }
  0x50   : > { %v1883_v5 = vld [vmem:[#allocation7 + $0x2e0] sm:$0xf]  ;;  %v2133_v6 = vld [vmem:[#allocation7 + $0x2ec] sm:$0xf0]  ;;  %v1756_v7 = vor.u32 %v2101_v4, %v1755_v2  ;;  %s1359_s28 = scalar_lea.hbm %s2730_s4, %s2168_s6  ;;  %s1360_s30 = sshll.u32 %s2672_s21, 4  ;;  %s1361_s30 = int_to_ptr.vmem [resolvable:$true] %s1360_s30 }
  0x51   : > { %v1884_v8 = vor.u32 %v2133_v6, %v1883_v5  ;;  %v2011_v9 = vld [vmem:[#allocation7 + $0x3e0] sm:$0xf]  ;;  %v2165_v10 = vld [vmem:[#allocation7 + $0x3ec] sm:$0xf0]  ;;  %1098 = vmatpush.bf16.msra.mxu0 %v1628_v3  ;;  %s1362_s5 = sshll.u32 %s1359_s28, 4  ;;  %s1347_s19 = scalar_lea.sflag [#allocation4], %s2606_s11  ;;  %s1363_s5 = int_to_ptr.hbm [resolvable:$true] %s1362_s5 }
  0x52   : > { %v1611_v11 = vld [vmem:[#allocation7 + $0xc0] sm:$0xf]  ;;  %v2012_v12 = vor.u32 %v2165_v10, %v2011_v9  ;;  %v2065_v13 = vld [vmem:[#allocation7 + $0xcc] sm:$0xf0]  ;;  %1112 = vmatpush.bf16.msra.mxu1 %v1756_v7  ;;  %s2381_s12 = sshra.s32 %s1363_s5, 4  ;;  %s2387_s9 = scalar_lea.hbm %s2730_s4, 128  ;;  %s2382_s12 = int_to_ptr.hbm [resolvable:$true] %s2381_s12 }
  0x53   : > { %v1739_v14 = vld [vmem:[#allocation7 + $0x1c0] sm:$0xf]  ;;  %v2097_v15 = vld [vmem:[#allocation7 + $0x1cc] sm:$0xf0]  ;;  %1126 = vmatpush.bf16.msra.mxu2 %v1884_v8  ;;  %v1612_v16 = vor.u32 %v2065_v13, %v1611_v11  ;;  %s2383_s3 = scalar_lea.hbm %s2382_s12, 64  ;;  %p2388_p2 = scmp.lt.s32.totalorder %s2382_s12, %s2730_s4 }
  0x54   : > { %v1740_v17 = vor.u32 %v2097_v15, %v1739_v14  ;;  %v1867_v18 = vld [vmem:[#allocation7 + $0x2c0] sm:$0xf]  ;;  %v2129_v19 = vld [vmem:[#allocation7 + $0x2cc] sm:$0xf0]  ;;  %1140 = vmatpush.bf16.msra.mxu3 %v2012_v12  ;;  %p2384_p1 = scmp.ne.s32.totalorder %s2382_s12, %s2383_s3  ;;  %p2389_p10 = scmp.lt.s32.totalorder %s2387_s9, %s2383_s3 }
  0x55   : > { %v1995_v20 = vld [vmem:[#allocation7 + $0x3c0] sm:$0xf]  ;;  %v1868_v21 = vor.u32 %v2129_v19, %v1867_v18  ;;  %v2161_v22 = vld [vmem:[#allocation7 + $0x3cc] sm:$0xf0]  ;;  %1099 = vmatpush.bf16.msra.mxu0 %v1612_v16 }
  0x56   : > { %v1595_v23 = vld [vmem:[#allocation7 + $0xa0] sm:$0xf]  ;;  %v2061_v24 = vld [vmem:[#allocation7 + $0xac] sm:$0xf0]  ;;  %v1996_v25 = vor.u32 %v2161_v22, %v1995_v20  ;;  %1113 = vmatpush.bf16.msra.mxu1 %v1740_v17  ;;  %p2385_p4 = pnand %p2384_p1, %p2549_p3  ;;  %p2390_p11 = por %p2389_p10, %p2388_p2 }
  0x57   : > { %v1723_v26 = vld [vmem:[#allocation7 + $0x1a0] sm:$0xf]  ;;  %v2093_v27 = vld [vmem:[#allocation7 + $0x1ac] sm:$0xf0]  ;;  %v1596_v29 = vor.u32 %v2061_v24, %v1595_v23  ;;  %1127 = vmatpush.bf16.msra.mxu2 %v1868_v21 }
  0x58   : > { %v1851_v28 = vld [vmem:[#allocation7 + $0x2a0] sm:$0xf]  ;;  %v2125_v30 = vld [vmem:[#allocation7 + $0x2ac] sm:$0xf0]  ;;  %v1724_v33 = vor.u32 %v2093_v27, %v1723_v26  ;;  %1141 = vmatpush.bf16.msra.mxu3 %v1996_v25  ;;  %p2386_p8 = pneg %p2385_p4 }
  0x59   : > { %v1979_v31 = vld [vmem:[#allocation7 + $0x3a0] sm:$0xf]  ;;  %v2157_v32 = vld [vmem:[#allocation7 + $0x3ac] sm:$0xf0]  ;;  %v1852_v34 = vor.u32 %v2125_v30, %v1851_v28  ;;  %1100 = vmatpush.bf16.msra.mxu0 %v1596_v29  ;;  %v2067_v28 = vld [vmem:[#allocation7 + $0xe4] sm:$0xf] }
  0x5a   : > { %v1579_v35 = vld [vmem:[#allocation7 + $0x80] sm:$0xf]  ;;  %v2057_v36 = vld [vmem:[#allocation7 + $0x8c] sm:$0xf0]  ;;  %v1980_v38 = vor.u32 %v2157_v32, %v1979_v31  ;;  %1114 = vmatpush.bf16.msra.mxu1 %v1724_v33  ;;  %v1629_v29 = vld [vmem:[#allocation7 + $0xf0] sm:$0xf0]  ;;  %p2391_p9 = pnand %p2390_p11, %p2386_p8 }
  0x5b   : > { %v1707_v37 = vld [vmem:[#allocation7 + $0x180] sm:$0xf]  ;;  %v2089_v39 = vld [vmem:[#allocation7 + $0x18c] sm:$0xf0]  ;;  %v1580_v44 = vor.u32 %v2057_v36, %v1579_v35  ;;  %1128 = vmatpush.bf16.msra.mxu2 %v1852_v34  ;;  %v2099_v30 = vld [vmem:[#allocation7 + $0x1e4] sm:$0xf] }
  0x5c   : > { %v1835_v40 = vld [vmem:[#allocation7 + $0x280] sm:$0xf]  ;;  %v2121_v41 = vld [vmem:[#allocation7 + $0x28c] sm:$0xf0]  ;;  %v1708_v45 = vor.u32 %v2089_v39, %v1707_v37  ;;  %1142 = vmatpush.bf16.msra.mxu3 %v1980_v38  ;;  %v1757_v32 = vld [vmem:[#allocation7 + $0x1f0] sm:$0xf0] }
  0x5d   : > { %v1963_v42 = vld [vmem:[#allocation7 + $0x380] sm:$0xf]  ;;  %v2153_v43 = vld [vmem:[#allocation7 + $0x38c] sm:$0xf0]  ;;  %v1836_v46 = vor.u32 %v2121_v41, %v1835_v40  ;;  %1101 = vmatpush.bf16.msra.mxu0 %v1580_v44  ;;  %v2131_v33 = vld [vmem:[#allocation7 + $0x2e4] sm:$0xf]  ;;  %v1632_v40 = vor.u32 %v2067_v28, %v1629_v29  ;;  %v1760_v41 = vor.u32 %v2099_v30, %v1757_v32 }
  0x5e   : > { %v1563_v47 = vld [vmem:[#allocation7 + $0x60] sm:$0xf]  ;;  %v2053_v48 = vld [vmem:[#allocation7 + $0x6c] sm:$0xf0]  ;;  %v1964_v50 = vor.u32 %v2153_v43, %v1963_v42  ;;  %1115 = vmatpush.bf16.msra.mxu1 %v1708_v45  ;;  %v1885_v34 = vld [vmem:[#allocation7 + $0x2f0] sm:$0xf0] }
  0x5f   : > { %v1691_v49 = vld [vmem:[#allocation7 + $0x160] sm:$0xf]  ;;  %v2085_v51 = vld [vmem:[#allocation7 + $0x16c] sm:$0xf0]  ;;  %v1564_v56 = vor.u32 %v2053_v48, %v1563_v47  ;;  %1129 = vmatpush.bf16.msra.mxu2 %v1836_v46  ;;  %v2163_v37 = vld [vmem:[#allocation7 + $0x3e4] sm:$0xf]  ;;  %v1888_v42 = vor.u32 %v2131_v33, %v1885_v34 }
  0x60   : > { %v1819_v52 = vld [vmem:[#allocation7 + $0x260] sm:$0xf]  ;;  %v2117_v53 = vld [vmem:[#allocation7 + $0x26c] sm:$0xf0]  ;;  %v1692_v57 = vor.u32 %v2085_v51, %v1691_v49  ;;  %1143 = vmatpush.bf16.msra.mxu3 %v1964_v50  ;;  %v2013_v38 = vld [vmem:[#allocation7 + $0x3f0] sm:$0xf0] }
  0x61   : > { %v1947_v54 = vld [vmem:[#allocation7 + $0x360] sm:$0xf]  ;;  %v2149_v55 = vld [vmem:[#allocation7 + $0x36c] sm:$0xf0]  ;;  %v1820_v58 = vor.u32 %v2117_v53, %v1819_v52  ;;  %1102 = vmatpush.bf16.msra.mxu0 %v1564_v56  ;;  %v2063_v43 = vld [vmem:[#allocation7 + $0xc4] sm:$0xf]  ;;  %v2016_v46 = vor.u32 %v2163_v37, %v2013_v38 }
  0x62   : > { %v1547_v59 = vld [vmem:[#allocation7 + $0x40] sm:$0xf]  ;;  %v2049_v60 = vld [vmem:[#allocation7 + $0x4c] sm:$0xf0]  ;;  %v1948_v62 = vor.u32 %v2149_v55, %v1947_v54  ;;  %1116 = vmatpush.bf16.msra.mxu1 %v1692_v57  ;;  %v1613_v44 = vld [vmem:[#allocation7 + $0xd0] sm:$0xf0] }
  0x63   : > { %v1675_v61 = vld [vmem:[#allocation7 + $0x140] sm:$0xf]  ;;  %v2081_v63 = vld [vmem:[#allocation7 + $0x14c] sm:$0xf0]  ;;  %v1548_v4 = vor.u32 %v2049_v60, %v1547_v59  ;;  %1130 = vmatpush.bf16.msra.mxu2 %v1820_v58  ;;  %v2095_v45 = vld [vmem:[#allocation7 + $0x1c4] sm:$0xf]  ;;  %v1616_v52 = vor.u32 %v2063_v43, %v1613_v44 }
  0x64   : > { %v1803_v0 = vld [vmem:[#allocation7 + $0x240] sm:$0xf]  ;;  %v2113_v1 = vld [vmem:[#allocation7 + $0x24c] sm:$0xf0]  ;;  %v1676_v5 = vor.u32 %v2081_v63, %v1675_v61  ;;  %1144 = vmatpush.bf16.msra.mxu3 %v1948_v62  ;;  %v1741_v47 = vld [vmem:[#allocation7 + $0x1d0] sm:$0xf0] }
  0x65   : > { %v1931_v2 = vld [vmem:[#allocation7 + $0x340] sm:$0xf]  ;;  %v2145_v3 = vld [vmem:[#allocation7 + $0x34c] sm:$0xf0]  ;;  %v1804_v6 = vor.u32 %v2113_v1, %v1803_v0  ;;  %1103 = vmatpush.bf16.msra.mxu0 %v1548_v4  ;;  %v2127_v48 = vld [vmem:[#allocation7 + $0x2c4] sm:$0xf]  ;;  %v1744_v54 = vor.u32 %v2095_v45, %v1741_v47 }
  0x66   : > { %v1531_v7 = vld [vmem:[#allocation7 + $0x20] sm:$0xf]  ;;  %v2045_v8 = vld [vmem:[#allocation7 + $0x2c] sm:$0xf0]  ;;  %v1932_v10 = vor.u32 %v2145_v3, %v1931_v2  ;;  %1117 = vmatpush.bf16.msra.mxu1 %v1676_v5  ;;  %v1869_v49 = vld [vmem:[#allocation7 + $0x2d0] sm:$0xf0] }
  0x67   : > { %v1659_v9 = vld [vmem:[#allocation7 + $0x120] sm:$0xf]  ;;  %v2077_v11 = vld [vmem:[#allocation7 + $0x12c] sm:$0xf0]  ;;  %v1532_v16 = vor.u32 %v2045_v8, %v1531_v7  ;;  %1131 = vmatpush.bf16.msra.mxu2 %v1804_v6  ;;  %v2159_v50 = vld [vmem:[#allocation7 + $0x3c4] sm:$0xf]  ;;  %v1872_v55 = vor.u32 %v2127_v48, %v1869_v49 }
  0x68   : > { %v1787_v12 = vld [vmem:[#allocation7 + $0x220] sm:$0xf]  ;;  %v2109_v13 = vld [vmem:[#allocation7 + $0x22c] sm:$0xf0]  ;;  %v1660_v19 = vor.u32 %v2077_v11, %v1659_v9  ;;  %1145 = vmatpush.bf16.msra.mxu3 %v1932_v10  ;;  %v1997_v51 = vld [vmem:[#allocation7 + $0x3d0] sm:$0xf0] }
  0x69   : > { %v1915_v14 = vld [vmem:[#allocation7 + $0x320] sm:$0xf]  ;;  %v2141_v15 = vld [vmem:[#allocation7 + $0x32c] sm:$0xf0]  ;;  %v1788_v20 = vor.u32 %v2109_v13, %v1787_v12  ;;  %1104 = vmatpush.bf16.msra.mxu0 %v1532_v16  ;;  %v2059_v53 = vld [vmem:[#allocation7 + $0xa4] sm:$0xf]  ;;  %v2000_v59 = vor.u32 %v2159_v50, %v1997_v51 }
  0x6a   : > { %v1515_v17 = vld [vmem:[#allocation7] sm:$0xf]  ;;  %v2041_v18 = vld [vmem:[#allocation7 + $0xc] sm:$0xf0]  ;;  %v1916_v24 = vor.u32 %v2141_v15, %v1915_v14  ;;  %1118 = vmatpush.bf16.msra.mxu1 %v1660_v19  ;;  %v1597_v56 = vld [vmem:[#allocation7 + $0xb0] sm:$0xf0] }
  0x6b   : > { %v1643_v21 = vld [vmem:[#allocation7 + $0x100] sm:$0xf]  ;;  %v2073_v22 = vld [vmem:[#allocation7 + $0x10c] sm:$0xf0]  ;;  %v1516_v31 = vor.u32 %v2041_v18, %v1515_v17  ;;  %1132 = vmatpush.bf16.msra.mxu2 %v1788_v20  ;;  %v2091_v57 = vld [vmem:[#allocation7 + $0x1a4] sm:$0xf]  ;;  %v1600_v2 = vor.u32 %v2059_v53, %v1597_v56 }
  0x6c   : > { %v1771_v23 = vld [vmem:[#allocation7 + $0x200] sm:$0xf]  ;;  %v2105_v25 = vld [vmem:[#allocation7 + $0x20c] sm:$0xf0]  ;;  %v1644_v35 = vor.u32 %v2073_v22, %v1643_v21  ;;  %1146 = vmatpush.bf16.msra.mxu3 %v1916_v24  ;;  %v1725_v58 = vld [vmem:[#allocation7 + $0x1b0] sm:$0xf0] }
  0x6d   : > { %v1899_v26 = vld [vmem:[#allocation7 + $0x300] sm:$0xf]  ;;  %v2137_v27 = vld [vmem:[#allocation7 + $0x30c] sm:$0xf0]  ;;  %v1772_v36 = vor.u32 %v2105_v25, %v1771_v23  ;;  %1105 = vmatpush.bf16.msra.mxu0 %v1516_v31  ;;  %v2123_v60 = vld [vmem:[#allocation7 + $0x2a4] sm:$0xf]  ;;  %v1728_v7 = vor.u32 %v2091_v57, %v1725_v58 }
  0x6e   : > { %v1900_v39 = vor.u32 %v2137_v27, %v1899_v26  ;;  %1119 = vmatpush.bf16.msra.mxu1 %v1644_v35  ;;  %v1853_v61 = vld [vmem:[#allocation7 + $0x2b0] sm:$0xf0]  ;;  %v2155_v62 = vld [vmem:[#allocation7 + $0x3a4] sm:$0xf]  ;;  %v1507_v5 = vld [vmem:[%s2610_s23 + $0x8] sm:$0xf] }
  0x6f   : > { %1133 = vmatpush.bf16.msra.mxu2 %v1772_v36  ;;  %v1981_v63 = vld [vmem:[#allocation7 + $0x3b0] sm:$0xf0]  ;;  %v2055_v0 = vld [vmem:[#allocation7 + $0x84] sm:$0xf]  ;;  %v2038_v6 = vld [vmem:[%s2610_s23 + $0x14] sm:$0xf0]  ;;  %v1856_v8 = vor.u32 %v2123_v60, %v1853_v61 }
  0x70   : > { %1147 = vmatpush.bf16.msra.mxu3 %v1900_v39  ;;  %v1581_v1 = vld [vmem:[#allocation7 + $0x90] sm:$0xf0]  ;;  %v2087_v3 = vld [vmem:[#allocation7 + $0x184] sm:$0xf]  ;;  %v2636_v9 = vor.u32 %v2038_v6, %v1507_v5  ;;  %v1499_v10 = vld [vmem:[%s2610_s23] sm:$0xf]  ;;  %v1984_v13 = vor.u32 %v2155_v62, %v1981_v63 }
  0x71   : > { %1154 = vmatpush.bf16.msrb.mxu0 %v1632_v40  ;;  %v1709_v4 = vld [vmem:[#allocation7 + $0x190] sm:$0xf0]  ;;  %v2037_v11 = vld [vmem:[%s2610_s23 + $0xc] sm:$0xf0]  ;;  %v2036_v12 = vld [vmem:[%s2610_s23 + $0xc] sm:$0xf]  ;;  %v1584_v21 = vor.u32 %v2055_v0, %v1581_v1 }
  0x72   : > { %1168 = vmatpush.bf16.msrb.mxu1 %v1760_v41  ;;  %v2119_v14 = vld [vmem:[#allocation7 + $0x284] sm:$0xf]  ;;  %v1837_v15 = vld [vmem:[#allocation7 + $0x290] sm:$0xf0]  ;;  %v2641_v16 = vor.u32 %v2037_v11, %v1499_v10  ;;  %v1509_v17 = vld [vmem:[%s2610_s23 + $0x18] sm:$0xf0]  ;;  %1134 = vmatmul.bf16.vlgmr.msra.gmra.mxu2 %v2636_v9  ;;  %v1712_v24 = vor.u32 %v2087_v3, %v1709_v4 }
  0x73   : > { %1182 = vmatpush.bf16.msrb.mxu2 %v1888_v42  ;;  %v2151_v18 = vld [vmem:[#allocation7 + $0x384] sm:$0xf]  ;;  %v1965_v19 = vld [vmem:[#allocation7 + $0x390] sm:$0xf0]  ;;  %v2645_v20 = vor.u32 %v2036_v12, %v1509_v17  ;;  %v1840_v25 = vor.u32 %v2119_v14, %v1837_v15  ;;  %v2070_v10 = vld [vmem:[#allocation7 + $0xf4] sm:$0xf0] }
  0x74   : > { %1196 = vmatpush.bf16.msrb.mxu3 %v2016_v46  ;;  %v2051_v22 = vld [vmem:[#allocation7 + $0x64] sm:$0xf]  ;;  %v1565_v23 = vld [vmem:[#allocation7 + $0x70] sm:$0xf0]  ;;  %v1968_v29 = vor.u32 %v2151_v18, %v1965_v19  ;;  %1106 = vmatmul.bf16.vlgmr.msra.gmra.mxu0 %v2641_v16  ;;  %v1763_v11 = vld [vmem:[#allocation7 + $0x1e8] sm:$0xf] }
  0x75   : > { %1155 = vmatpush.bf16.msrb.mxu0 %v1616_v52  ;;  %v2083_v26 = vld [vmem:[#allocation7 + $0x164] sm:$0xf]  ;;  %v1501_v28 = vld [vmem:[%s2610_s23 + $0x10] sm:$0xf0]  ;;  %1148 = vmatmul.bf16.vlgmr.msra.gmra.mxu3 %v2645_v20  ;;  %v1568_v36 = vor.u32 %v2051_v22, %v1565_v23  ;;  %v1891_v14 = vld [vmem:[#allocation7 + $0x2e8] sm:$0xf] }
  0x76   : > { %1169 = vmatpush.bf16.msrb.mxu1 %v1744_v54  ;;  %v2035_v27 = vld [vmem:[%s2610_s23 + $0x4] sm:$0xf]  ;;  %v1693_v30 = vld [vmem:[#allocation7 + $0x170] sm:$0xf0]  ;;  %v2134_v15 = vld [vmem:[#allocation7 + $0x2f4] sm:$0xf0] }
  0x77   : > { %1183 = vmatpush.bf16.msrb.mxu2 %v1872_v55  ;;  %v2115_v31 = vld [vmem:[#allocation7 + $0x264] sm:$0xf]  ;;  %v1821_v32 = vld [vmem:[#allocation7 + $0x270] sm:$0xf0]  ;;  %v2650_v33 = vor.u32 %v2035_v27, %v1501_v28  ;;  %v1696_v37 = vor.u32 %v2083_v26, %v1693_v30  ;;  %v2019_v19 = vld [vmem:[#allocation7 + $0x3e8] sm:$0xf] }
  0x78   : > { %1197 = vmatpush.bf16.msrb.mxu3 %v2000_v59  ;;  %v2147_v34 = vld [vmem:[#allocation7 + $0x364] sm:$0xf]  ;;  %v1949_v35 = vld [vmem:[#allocation7 + $0x370] sm:$0xf0]  ;;  %v1824_v38 = vor.u32 %v2115_v31, %v1821_v32  ;;  %v1619_v26 = vld [vmem:[#allocation7 + $0xc8] sm:$0xf] }
  0x79   : > { %1156 = vmatpush.bf16.msrb.mxu0 %v1600_v2  ;;  %1120 = vmatmul.bf16.vlgmr.msra.gmra.mxu1 %v2650_v33  ;;  %v2047_v39 = vld [vmem:[#allocation7 + $0x44] sm:$0xf]  ;;  %v1549_v40 = vld [vmem:[#allocation7 + $0x50] sm:$0xf0]  ;;  %v1952_v42 = vor.u32 %v2147_v34, %v1949_v35  ;;  %v2066_v27 = vld [vmem:[#allocation7 + $0xd4] sm:$0xf0] }
  0x7a   : > { %1170 = vmatpush.bf16.msrb.mxu1 %v1728_v7  ;;  %v2079_v41 = vld [vmem:[#allocation7 + $0x144] sm:$0xf]  ;;  %v1677_v43 = vld [vmem:[#allocation7 + $0x150] sm:$0xf0]  ;;  %v1552_v48 = vor.u32 %v2047_v39, %v1549_v40  ;;  %v1747_v28 = vld [vmem:[#allocation7 + $0x1c8] sm:$0xf] }
  0x7b   : > { %1184 = vmatpush.bf16.msrb.mxu2 %v1856_v8  ;;  %v2111_v44 = vld [vmem:[#allocation7 + $0x244] sm:$0xf]  ;;  %v1805_v45 = vld [vmem:[#allocation7 + $0x250] sm:$0xf0]  ;;  %v1680_v49 = vor.u32 %v2079_v41, %v1677_v43  ;;  %v1635_v8 = vld [vmem:[#allocation7 + $0xe8] sm:$0xf] }
  0x7c   : > { %1198 = vmatpush.bf16.msrb.mxu3 %v1984_v13  ;;  %v2143_v46 = vld [vmem:[#allocation7 + $0x344] sm:$0xf]  ;;  %v1933_v47 = vld [vmem:[#allocation7 + $0x350] sm:$0xf0]  ;;  %v1808_v50 = vor.u32 %v2111_v44, %v1805_v45  ;;  %v2102_v13 = vld [vmem:[#allocation7 + $0x1f4] sm:$0xf0]  ;;  %v1636_v23 = vor.u32 %v2070_v10, %v1635_v8 }
  0x7d   : > { %1157 = vmatpush.bf16.msrb.mxu0 %v1584_v21  ;;  %v2043_v51 = vld [vmem:[#allocation7 + $0x24] sm:$0xf]  ;;  %v1533_v52 = vld [vmem:[#allocation7 + $0x30] sm:$0xf0]  ;;  %v1936_v54 = vor.u32 %v2143_v46, %v1933_v47  ;;  %v2166_v21 = vld [vmem:[#allocation7 + $0x3f4] sm:$0xf0] }
  0x7e   : > { %1171 = vmatpush.bf16.msrb.mxu1 %v1712_v24  ;;  %v2075_v53 = vld [vmem:[#allocation7 + $0x124] sm:$0xf]  ;;  %v1661_v55 = vld [vmem:[#allocation7 + $0x130] sm:$0xf0]  ;;  %v1536_v60 = vor.u32 %v2043_v51, %v1533_v52  ;;  %v1764_v24 = vor.u32 %v2102_v13, %v1763_v11  ;;  %v2098_v30 = vld [vmem:[#allocation7 + $0x1d4] sm:$0xf0] }
  0x7f   : > { %1185 = vmatpush.bf16.msrb.mxu2 %v1840_v25  ;;  %v2107_v56 = vld [vmem:[#allocation7 + $0x224] sm:$0xf]  ;;  %v1789_v57 = vld [vmem:[#allocation7 + $0x230] sm:$0xf0]  ;;  %v1664_v63 = vor.u32 %v2075_v53, %v1661_v55  ;;  %v1892_v25 = vor.u32 %v2134_v15, %v1891_v14  ;;  %v1875_v31 = vld [vmem:[#allocation7 + $0x2c8] sm:$0xf] }
  0x80   : > { %1199 = vmatpush.bf16.msrb.mxu3 %v1968_v29  ;;  %v2139_v58 = vld [vmem:[#allocation7 + $0x324] sm:$0xf]  ;;  %v1917_v59 = vld [vmem:[#allocation7 + $0x330] sm:$0xf0]  ;;  %v1792_v0 = vor.u32 %v2107_v56, %v1789_v57  ;;  %v2020_v29 = vor.u32 %v2166_v21, %v2019_v19  ;;  %v2130_v32 = vld [vmem:[#allocation7 + $0x2d4] sm:$0xf0] }
  0x81   : > { %1158 = vmatpush.bf16.msrb.mxu0 %v1568_v36  ;;  %v2039_v61 = vld [vmem:[#allocation7 + $0x4] sm:$0xf]  ;;  %v1517_v62 = vld [vmem:[#allocation7 + $0x10] sm:$0xf0]  ;;  %v1920_v4 = vor.u32 %v2139_v58, %v1917_v59  ;;  %v2003_v34 = vld [vmem:[#allocation7 + $0x3c8] sm:$0xf]  ;;  %v1620_v36 = vor.u32 %v2066_v27, %v1619_v26 }
  0x82   : > { %1172 = vmatpush.bf16.msrb.mxu1 %v1696_v37  ;;  %v2071_v1 = vld [vmem:[#allocation7 + $0x104] sm:$0xf]  ;;  %v1645_v2 = vld [vmem:[#allocation7 + $0x110] sm:$0xf0]  ;;  %v1520_v12 = vor.u32 %v2039_v61, %v1517_v62  ;;  %v2162_v35 = vld [vmem:[#allocation7 + $0x3d4] sm:$0xf0]  ;;  %v1748_v37 = vor.u32 %v2098_v30, %v1747_v28 }
  0x83   : > { %1186 = vmatpush.bf16.msrb.mxu2 %v1824_v38  ;;  %v2103_v3 = vld [vmem:[#allocation7 + $0x204] sm:$0xf]  ;;  %v1773_v5 = vld [vmem:[#allocation7 + $0x210] sm:$0xf0]  ;;  %v1648_v17 = vor.u32 %v2071_v1, %v1645_v2  ;;  %v1876_v38 = vor.u32 %v2130_v32, %v1875_v31  ;;  %v1603_v39 = vld [vmem:[#allocation7 + $0xa8] sm:$0xf] }
  0x84   : > { %1200 = vmatpush.bf16.msrb.mxu3 %v1952_v42  ;;  %v2135_v6 = vld [vmem:[#allocation7 + $0x304] sm:$0xf]  ;;  %v1901_v7 = vld [vmem:[#allocation7 + $0x310] sm:$0xf0]  ;;  %v1776_v18 = vor.u32 %v2103_v3, %v1773_v5  ;;  %v2062_v40 = vld [vmem:[#allocation7 + $0xb4] sm:$0xf0]  ;;  %v2004_v42 = vor.u32 %v2162_v35, %v2003_v34 }
  0x85   : > { %1159 = vmatpush.bf16.msrb.mxu0 %v1552_v48  ;;  %v1904_v22 = vor.u32 %v2135_v6, %v1901_v7  ;;  %v1731_v41 = vld [vmem:[#allocation7 + $0x1a8] sm:$0xf]  ;;  %v2094_v43 = vld [vmem:[#allocation7 + $0x1b4] sm:$0xf0]  ;;  %v1604_v48 = vor.u32 %v2062_v40, %v1603_v39 }
  0x86   : > { %1173 = vmatpush.bf16.msrb.mxu1 %v1680_v49  ;;  %v1859_v44 = vld [vmem:[#allocation7 + $0x2a8] sm:$0xf]  ;;  %v2126_v45 = vld [vmem:[#allocation7 + $0x2b4] sm:$0xf0]  ;;  %v1732_v49 = vor.u32 %v2094_v43, %v1731_v41 }
  0x87   : > { %1187 = vmatpush.bf16.msrb.mxu2 %v1808_v50  ;;  %v1987_v46 = vld [vmem:[#allocation7 + $0x3a8] sm:$0xf]  ;;  %v2158_v47 = vld [vmem:[#allocation7 + $0x3b4] sm:$0xf0]  ;;  %v1860_v50 = vor.u32 %v2126_v45, %v1859_v44 }
  0x88   : > { %1201 = vmatpush.bf16.msrb.mxu3 %v1936_v54  ;;  %v1587_v51 = vld [vmem:[#allocation7 + $0x88] sm:$0xf]  ;;  %v2058_v52 = vld [vmem:[#allocation7 + $0x94] sm:$0xf0]  ;;  %v1988_v54 = vor.u32 %v2158_v47, %v1987_v46 }
  0x89   : > { %1160 = vmatpush.bf16.msrb.mxu0 %v1536_v60  ;;  %v1715_v53 = vld [vmem:[#allocation7 + $0x188] sm:$0xf]  ;;  %v2090_v55 = vld [vmem:[#allocation7 + $0x194] sm:$0xf0]  ;;  %v1588_v60 = vor.u32 %v2058_v52, %v1587_v51  ;;  %v1765_v52 = vld [vmem:[#allocation7 + $0x1f8] sm:$0xf0] }
  0x8a   : > { %1174 = vmatpush.bf16.msrb.mxu1 %v1664_v63  ;;  %v1843_v56 = vld [vmem:[#allocation7 + $0x288] sm:$0xf]  ;;  %v2122_v57 = vld [vmem:[#allocation7 + $0x294] sm:$0xf0]  ;;  %v1716_v61 = vor.u32 %v2090_v55, %v1715_v53  ;;  %v2132_v53 = vld [vmem:[#allocation7 + $0x2ec] sm:$0xf] }
  0x8b   : > { %1188 = vmatpush.bf16.msrb.mxu2 %v1792_v0  ;;  %v1971_v58 = vld [vmem:[#allocation7 + $0x388] sm:$0xf]  ;;  %v2154_v59 = vld [vmem:[#allocation7 + $0x394] sm:$0xf0]  ;;  %v1844_v62 = vor.u32 %v2122_v57, %v1843_v56  ;;  %v2164_v57 = vld [vmem:[#allocation7 + $0x3ec] sm:$0xf] }
  0x8c   : > { %1202 = vmatpush.bf16.msrb.mxu3 %v1920_v4  ;;  %v1571_v63 = vld [vmem:[#allocation7 + $0x68] sm:$0xf]  ;;  %v2054_v0 = vld [vmem:[#allocation7 + $0x74] sm:$0xf0]  ;;  %v1972_v2 = vor.u32 %v2154_v59, %v1971_v58  ;;  %v2021_v58 = vld [vmem:[#allocation7 + $0x3f8] sm:$0xf0] }
  0x8d   : > { %1161 = vmatpush.bf16.msrb.mxu0 %v1520_v12  ;;  %v1699_v1 = vld [vmem:[#allocation7 + $0x168] sm:$0xf]  ;;  %v2086_v3 = vld [vmem:[#allocation7 + $0x174] sm:$0xf0]  ;;  %v1572_v8 = vor.u32 %v2054_v0, %v1571_v63  ;;  %v2064_v63 = vld [vmem:[#allocation7 + $0xcc] sm:$0xf] }
  0x8e   : > { %1175 = vmatpush.bf16.msrb.mxu1 %v1648_v17  ;;  %v1827_v4 = vld [vmem:[#allocation7 + $0x268] sm:$0xf]  ;;  %v2118_v5 = vld [vmem:[#allocation7 + $0x274] sm:$0xf0]  ;;  %v1700_v10 = vor.u32 %v2086_v3, %v1699_v1  ;;  %v1621_v0 = vld [vmem:[#allocation7 + $0xd8] sm:$0xf0] }
  0x8f   : > { %1189 = vmatpush.bf16.msrb.mxu2 %v1776_v18  ;;  %v1955_v6 = vld [vmem:[#allocation7 + $0x368] sm:$0xf]  ;;  %v2150_v7 = vld [vmem:[#allocation7 + $0x374] sm:$0xf0]  ;;  %v1828_v11 = vor.u32 %v2118_v5, %v1827_v4  ;;  %v2096_v1 = vld [vmem:[#allocation7 + $0x1cc] sm:$0xf] }
  0x90   : > { %1203 = vmatpush.bf16.msrb.mxu3 %v1904_v22  ;;  %1162 = vmatmul.bf16.vlgmr.msrb.gmra.mxu0 %v2641_v16  ;;  %v1555_v12 = vld [vmem:[#allocation7 + $0x48] sm:$0xf]  ;;  %v2050_v13 = vld [vmem:[#allocation7 + $0x54] sm:$0xf0]  ;;  %v1956_v15 = vor.u32 %v2150_v7, %v1955_v6  ;;  %v1749_v3 = vld [vmem:[#allocation7 + $0x1d8] sm:$0xf0] }
  0x91   : > { %1210 = vmatpush.bf16.msra.mxu0 %v1636_v23  ;;  %1176 = vmatmul.bf16.vlgmr.msrb.gmra.mxu1 %v2650_v33  ;;  %v1683_v14 = vld [vmem:[#allocation7 + $0x148] sm:$0xf]  ;;  %v2082_v17 = vld [vmem:[#allocation7 + $0x154] sm:$0xf0]  ;;  %v1556_v23 = vor.u32 %v2050_v13, %v1555_v12  ;;  %v2128_v4 = vld [vmem:[#allocation7 + $0x2cc] sm:$0xf] }
  0x92   : > { %1224 = vmatpush.bf16.msra.mxu1 %v1764_v24  ;;  %1190 = vmatmul.bf16.vlgmr.msrb.gmra.mxu2 %v2636_v9  ;;  %v1811_v18 = vld [vmem:[#allocation7 + $0x248] sm:$0xf]  ;;  %v2114_v19 = vld [vmem:[#allocation7 + $0x254] sm:$0xf0]  ;;  %v1684_v24 = vor.u32 %v2082_v17, %v1683_v14  ;;  %v1877_v5 = vld [vmem:[#allocation7 + $0x2d8] sm:$0xf0] }
  0x93   : > { %1238 = vmatpush.bf16.msra.mxu2 %v1892_v25  ;;  %1204 = vmatmul.bf16.vlgmr.msrb.gmra.mxu3 %v2645_v20  ;;  %v1939_v21 = vld [vmem:[#allocation7 + $0x348] sm:$0xf]  ;;  %v2146_v22 = vld [vmem:[#allocation7 + $0x354] sm:$0xf0]  ;;  %v1812_v25 = vor.u32 %v2114_v19, %v1811_v18  ;;  %v2160_v6 = vld [vmem:[#allocation7 + $0x3cc] sm:$0xf] }
  0x94   : > { %1252 = vmatpush.bf16.msra.mxu3 %v2020_v29  ;;  %v1539_v26 = vld [vmem:[#allocation7 + $0x28] sm:$0xf]  ;;  %v2046_v27 = vld [vmem:[#allocation7 + $0x34] sm:$0xf0]  ;;  %v1940_v29 = vor.u32 %v2146_v22, %v1939_v21  ;;  %v2005_v7 = vld [vmem:[#allocation7 + $0x3d8] sm:$0xf0] }
  0x95   : > { %1211 = vmatpush.bf16.msra.mxu0 %v1620_v36  ;;  %v1667_v28 = vld [vmem:[#allocation7 + $0x128] sm:$0xf]  ;;  %v2078_v30 = vld [vmem:[#allocation7 + $0x134] sm:$0xf0]  ;;  %v1540_v36 = vor.u32 %v2046_v27, %v1539_v26  ;;  %v2060_v12 = vld [vmem:[#allocation7 + $0xac] sm:$0xf] }
  0x96   : > { %1225 = vmatpush.bf16.msra.mxu1 %v1748_v37  ;;  %v1795_v31 = vld [vmem:[#allocation7 + $0x228] sm:$0xf]  ;;  %v2110_v32 = vld [vmem:[#allocation7 + $0x234] sm:$0xf0]  ;;  %v1668_v39 = vor.u32 %v2078_v30, %v1667_v28  ;;  %v1605_v13 = vld [vmem:[#allocation7 + $0xb8] sm:$0xf0] }
  0x97   : > { %1239 = vmatpush.bf16.msra.mxu2 %v1876_v38  ;;  %v1923_v34 = vld [vmem:[#allocation7 + $0x328] sm:$0xf]  ;;  %v2142_v35 = vld [vmem:[#allocation7 + $0x334] sm:$0xf0]  ;;  %v1796_v40 = vor.u32 %v2110_v32, %v1795_v31  ;;  %v2092_v14 = vld [vmem:[#allocation7 + $0x1ac] sm:$0xf] }
  0x98   : > { %1253 = vmatpush.bf16.msra.mxu3 %v2004_v42  ;;  %v1523_v37 = vld [vmem:[#allocation7 + $0x8] sm:$0xf]  ;;  %v2042_v38 = vld [vmem:[#allocation7 + $0x14] sm:$0xf0]  ;;  %v1924_v44 = vor.u32 %v2142_v35, %v1923_v34  ;;  %v1733_v17 = vld [vmem:[#allocation7 + $0x1b8] sm:$0xf0] }
  0x99   : > { %1212 = vmatpush.bf16.msra.mxu0 %v1604_v48  ;;  %v1651_v41 = vld [vmem:[#allocation7 + $0x108] sm:$0xf]  ;;  %v2074_v42 = vld [vmem:[#allocation7 + $0x114] sm:$0xf0]  ;;  %v2068_v48 = vld [vmem:[#allocation7 + $0xec] sm:$0xf]  ;;  %v1524_v51 = vor.u32 %v2042_v38, %v1523_v37 }
  0x9a   : > { %1226 = vmatpush.bf16.msra.mxu1 %v1732_v49  ;;  %v1779_v43 = vld [vmem:[#allocation7 + $0x208] sm:$0xf]  ;;  %v2106_v45 = vld [vmem:[#allocation7 + $0x214] sm:$0xf0]  ;;  %v1637_v49 = vld [vmem:[#allocation7 + $0xf8] sm:$0xf0]  ;;  %v1652_v55 = vor.u32 %v2074_v42, %v1651_v41 }
  0x9b   : > { %1240 = vmatpush.bf16.msra.mxu2 %v1860_v50  ;;  %v1907_v46 = vld [vmem:[#allocation7 + $0x308] sm:$0xf]  ;;  %v2138_v47 = vld [vmem:[#allocation7 + $0x314] sm:$0xf0]  ;;  %v2100_v50 = vld [vmem:[#allocation7 + $0x1ec] sm:$0xf]  ;;  %v1780_v56 = vor.u32 %v2106_v45, %v1779_v43 }
  0x9c   : > { %1254 = vmatpush.bf16.msra.mxu3 %v1988_v54  ;;  %v1893_v54 = vld [vmem:[#allocation7 + $0x2f8] sm:$0xf0]  ;;  %v1908_v59 = vor.u32 %v2138_v47, %v1907_v46  ;;  %v2124_v18 = vld [vmem:[#allocation7 + $0x2ac] sm:$0xf] }
  0x9d   : > { %1213 = vmatpush.bf16.msra.mxu0 %v1588_v60  ;;  %v1640_v60 = vor.u32 %v2068_v48, %v1637_v49  ;;  %v1861_v19 = vld [vmem:[#allocation7 + $0x2b8] sm:$0xf0]  ;;  %v2156_v21 = vld [vmem:[#allocation7 + $0x3ac] sm:$0xf] }
  0x9e   : > { %1227 = vmatpush.bf16.msra.mxu1 %v1716_v61  ;;  %v1768_v61 = vor.u32 %v2100_v50, %v1765_v52  ;;  %v1989_v22 = vld [vmem:[#allocation7 + $0x3b8] sm:$0xf0]  ;;  %v2056_v26 = vld [vmem:[#allocation7 + $0x8c] sm:$0xf] }
  0x9f   : > { %1241 = vmatpush.bf16.msra.mxu2 %v1844_v62  ;;  %v1896_v62 = vor.u32 %v2132_v53, %v1893_v54  ;;  %v1589_v27 = vld [vmem:[#allocation7 + $0x98] sm:$0xf0]  ;;  %v2088_v28 = vld [vmem:[#allocation7 + $0x18c] sm:$0xf] }
  0xa0   : > { %1255 = vmatpush.bf16.msra.mxu3 %v1972_v2  ;;  %v2024_v2 = vor.u32 %v2164_v57, %v2021_v58  ;;  %v1717_v30 = vld [vmem:[#allocation7 + $0x198] sm:$0xf0]  ;;  %v2120_v31 = vld [vmem:[#allocation7 + $0x28c] sm:$0xf] }
  0xa1   : > { %1214 = vmatpush.bf16.msra.mxu0 %v1572_v8  ;;  %v1624_v8 = vor.u32 %v2064_v63, %v1621_v0  ;;  %v1845_v32 = vld [vmem:[#allocation7 + $0x298] sm:$0xf0]  ;;  %v2152_v34 = vld [vmem:[#allocation7 + $0x38c] sm:$0xf]  ;;  %v1720_v37 = vor.u32 %v2088_v28, %v1717_v30 }
  0xa2   : > { %1228 = vmatpush.bf16.msra.mxu1 %v1700_v10  ;;  %v1752_v10 = vor.u32 %v2096_v1, %v1749_v3  ;;  %v1973_v35 = vld [vmem:[#allocation7 + $0x398] sm:$0xf0]  ;;  %v1848_v38 = vor.u32 %v2120_v31, %v1845_v32  ;;  %v2084_v41 = vld [vmem:[#allocation7 + $0x16c] sm:$0xf] }
  0xa3   : > { %1242 = vmatpush.bf16.msra.mxu2 %v1828_v11  ;;  %v1880_v11 = vor.u32 %v2128_v4, %v1877_v5  ;;  %v1976_v42 = vor.u32 %v2152_v34, %v1973_v35  ;;  %v1701_v43 = vld [vmem:[#allocation7 + $0x178] sm:$0xf0]  ;;  %v2148_v46 = vld [vmem:[#allocation7 + $0x36c] sm:$0xf] }
  0xa4   : > { %1256 = vmatpush.bf16.msra.mxu3 %v1956_v15  ;;  %v2008_v15 = vor.u32 %v2160_v6, %v2005_v7  ;;  %v1829_v45 = vld [vmem:[#allocation7 + $0x278] sm:$0xf0]  ;;  %v1704_v49 = vor.u32 %v2084_v41, %v1701_v43  ;;  %v2080_v53 = vld [vmem:[#allocation7 + $0x14c] sm:$0xf]  ;;  %v1326_v43 = vld [vmem:[%s2620_s27 + $0x20] sm:$0xff] }
  0xa5   : > { %1215 = vmatpush.bf16.msra.mxu0 %v1556_v23  ;;  %v1608_v23 = vor.u32 %v2060_v12, %v1605_v13  ;;  %v1957_v47 = vld [vmem:[#allocation7 + $0x378] sm:$0xf0]  ;;  %v2144_v58 = vld [vmem:[#allocation7 + $0x34c] sm:$0xf] }
  0xa6   : > { %1229 = vmatpush.bf16.msra.mxu1 %v1684_v24  ;;  %v1736_v24 = vor.u32 %v2092_v14, %v1733_v17  ;;  %v1557_v52 = vld [vmem:[#allocation7 + $0x58] sm:$0xf0]  ;;  %v1960_v54 = vor.u32 %v2148_v46, %v1957_v47  ;;  %v2044_v63 = vld [vmem:[#allocation7 + $0x2c] sm:$0xf] }
  0xa7   : > { %1243 = vmatpush.bf16.msra.mxu2 %v1812_v25  ;;  %v1864_v25 = vor.u32 %v2124_v18, %v1861_v19  ;;  %v1813_v57 = vld [vmem:[#allocation7 + $0x258] sm:$0xf0]  ;;  %v2076_v1 = vld [vmem:[#allocation7 + $0x12c] sm:$0xf] }
  0xa8   : > { %1257 = vmatpush.bf16.msra.mxu3 %v1940_v29  ;;  %v1992_v29 = vor.u32 %v2156_v21, %v1989_v22  ;;  %v1541_v0 = vld [vmem:[#allocation7 + $0x38] sm:$0xf0]  ;;  %v2108_v4 = vld [vmem:[#allocation7 + $0x22c] sm:$0xf] }
  0xa9   : > { %1216 = vmatpush.bf16.msra.mxu0 %v1540_v36  ;;  %v1592_v36 = vor.u32 %v2056_v26, %v1589_v27  ;;  %v1669_v3 = vld [vmem:[#allocation7 + $0x138] sm:$0xf0]  ;;  %v2140_v6 = vld [vmem:[#allocation7 + $0x32c] sm:$0xf]  ;;  %v2666_v27 = vld [vmem:[#allocation8] sm:$0xf] }
  0xaa   : > { %1230 = vmatpush.bf16.msra.mxu1 %v1668_v39  ;;  %v2052_v39 = vld [vmem:[#allocation7 + $0x6c] sm:$0xf]  ;;  %v1797_v5 = vld [vmem:[#allocation7 + $0x238] sm:$0xf0]  ;;  %v430_v28 = vperm.slane %v2666_v27, 0  ;;  %v431_v46 = vperm.slane %v2666_v27, 1 }
  0xab   : > { %1244 = vmatpush.bf16.msra.mxu2 %v1796_v40  ;;  %v1573_v40 = vld [vmem:[#allocation7 + $0x78] sm:$0xf0]  ;;  %v2040_v12 = vld [vmem:[#allocation7 + $0xc] sm:$0xf] }
  0xac   : > { %1258 = vmatpush.bf16.msra.mxu3 %v1924_v44  ;;  %v2116_v44 = vld [vmem:[#allocation7 + $0x26c] sm:$0xf]  ;;  %v1576_v48 = vor.u32 %v2052_v39, %v1573_v40  ;;  %v1925_v7 = vld [vmem:[#allocation7 + $0x338] sm:$0xf0] }
  0xad   : > { %1217 = vmatpush.bf16.msra.mxu0 %v1524_v51  ;;  %v1832_v50 = vor.u32 %v2116_v44, %v1829_v45  ;;  %v2048_v51 = vld [vmem:[#allocation7 + $0x4c] sm:$0xf]  ;;  %v1525_v13 = vld [vmem:[#allocation7 + $0x18] sm:$0xf0] }
  0xae   : > { %1231 = vmatpush.bf16.msra.mxu1 %v1652_v55  ;;  %v1685_v55 = vld [vmem:[#allocation7 + $0x158] sm:$0xf0]  ;;  %v2072_v14 = vld [vmem:[#allocation7 + $0x10c] sm:$0xf] }
  0xaf   : > { %1245 = vmatpush.bf16.msra.mxu2 %v1780_v56  ;;  %v2112_v56 = vld [vmem:[#allocation7 + $0x24c] sm:$0xf]  ;;  %v1653_v17 = vld [vmem:[#allocation7 + $0x118] sm:$0xf0] }
  0xb0   : > { %1259 = vmatpush.bf16.msra.mxu3 %v1908_v59  ;;  %1218 = vmatmul.bf16.vlgmr.msra.gmra.mxu0 %v2641_v16  ;;  %v1941_v59 = vld [vmem:[#allocation7 + $0x358] sm:$0xf0]  ;;  %v2104_v18 = vld [vmem:[#allocation7 + $0x20c] sm:$0xf] }
  0xb1   : > { %1266 = vmatpush.bf16.msrb.mxu0 %v1640_v60  ;;  %1232 = vmatmul.bf16.vlgmr.msra.gmra.mxu1 %v2650_v33  ;;  %v1560_v60 = vor.u32 %v2048_v51, %v1557_v52  ;;  %v1781_v19 = vld [vmem:[#allocation7 + $0x218] sm:$0xf0]  ;;  %v2136_v21 = vld [vmem:[#allocation7 + $0x30c] sm:$0xf] }
  0xb2   : > { %1280 = vmatpush.bf16.msrb.mxu1 %v1768_v61  ;;  %1246 = vmatmul.bf16.vlgmr.msra.gmra.mxu2 %v2636_v9  ;;  %v1688_v61 = vor.u32 %v2080_v53, %v1685_v55  ;;  %v1909_v22 = vld [vmem:[#allocation7 + $0x318] sm:$0xf0] }
  0xb3   : > { %1294 = vmatpush.bf16.msrb.mxu2 %v1896_v62  ;;  %1260 = vmatmul.bf16.vlgmr.msra.gmra.mxu3 %v2645_v20  ;;  %v1816_v62 = vor.u32 %v2112_v56, %v1813_v57  ;;  %v1912_v26 = vor.u32 %v2136_v21, %v1909_v22 }
  0xb4   : > { %1308 = vmatpush.bf16.msrb.mxu3 %v2024_v2  ;;  %v1944_v2 = vor.u32 %v2144_v58, %v1941_v59 }
  0xb5   : > { %1267 = vmatpush.bf16.msrb.mxu0 %v1624_v8  ;;  %v1544_v8 = vor.u32 %v2044_v63, %v1541_v0  ;;  %v1327_v0 = vld [vmem:[%s2620_s27 + $0x28] sm:$0xff] }
  0xb6   : > { %1281 = vmatpush.bf16.msrb.mxu1 %v1752_v10  ;;  %v1672_v10 = vor.u32 %v2076_v1, %v1669_v3  ;;  %v432_v3 = vperm.slane %v2666_v27, 2 }
  0xb7   : > { %1295 = vmatpush.bf16.msrb.mxu2 %v1880_v11  ;;  %v1800_v11 = vor.u32 %v2108_v4, %v1797_v5 }
  0xb8   : > { %1309 = vmatpush.bf16.msrb.mxu3 %v2008_v15  ;;  %v1928_v15 = vor.u32 %v2140_v6, %v1925_v7 }
  0xb9   : > { %1268 = vmatpush.bf16.msrb.mxu0 %v1608_v23  ;;  %v1528_v23 = vor.u32 %v2040_v12, %v1525_v13  ;;  %v1324_v12 = vld [vmem:[%s2620_s27 + $0x10] sm:$0xff] }
  0xba   : > { %1282 = vmatpush.bf16.msrb.mxu1 %v1736_v24  ;;  %v1656_v24 = vor.u32 %v2072_v14, %v1653_v17 }
  0xbb   : > { %1296 = vmatpush.bf16.msrb.mxu2 %v1864_v25  ;;  %v1784_v25 = vor.u32 %v2104_v18, %v1781_v19 }
  0xbc   : > { %1310 = vmatpush.bf16.msrb.mxu3 %v1992_v29 }
  0xbd   : > { %1269 = vmatpush.bf16.msrb.mxu0 %v1592_v36 }
  0xbe   : > { %1283 = vmatpush.bf16.msrb.mxu1 %v1720_v37 }
  0xbf   : > { %1297 = vmatpush.bf16.msrb.mxu2 %v1848_v38 }
  0xc0   : > { %1311 = vmatpush.bf16.msrb.mxu3 %v1976_v42 }
  0xc1   : > { %1270 = vmatpush.bf16.msrb.mxu0 %v1576_v48 }
  0xc2   : > { %1284 = vmatpush.bf16.msrb.mxu1 %v1704_v49 }
  0xc3   : > { %1298 = vmatpush.bf16.msrb.mxu2 %v1832_v50 }
  0xc4   : > { %1312 = vmatpush.bf16.msrb.mxu3 %v1960_v54  ;;  %v1323_v54 = vld [vmem:[%s2620_s27 + $0x8] sm:$0xff] }
  0xc5   : > { %1271 = vmatpush.bf16.msrb.mxu0 %v1560_v60 }
  0xc6   : > { %1285 = vmatpush.bf16.msrb.mxu1 %v1688_v61 }
  0xc7   : > { %1299 = vmatpush.bf16.msrb.mxu2 %v1816_v62 }
  0xc8   : > { %1313 = vmatpush.bf16.msrb.mxu3 %v1944_v2 }
  0xc9   : > { %1272 = vmatpush.bf16.msrb.mxu0 %v1544_v8 }
  0xca   : > { %1286 = vmatpush.bf16.msrb.mxu1 %v1672_v10 }
  0xcb   : > { %1300 = vmatpush.bf16.msrb.mxu2 %v1800_v11 }
  0xcc   : > { %1314 = vmatpush.bf16.msrb.mxu3 %v1928_v15 }
  0xcd   : > { %1273 = vmatpush.bf16.msrb.mxu0 %v1528_v23 }
  0xce   : > { %1287 = vmatpush.bf16.msrb.mxu1 %v1656_v24  ;;  %v1328_v24 = vld [vmem:[%s2620_s27 + $0x30] sm:$0xff] }
  0xcf   : > { %1301 = vmatpush.bf16.msrb.mxu2 %v1784_v25 }
  0xd0   : > { %1315 = vmatpush.bf16.msrb.mxu3 %v1912_v26  ;;  %1274 = vmatmul.bf16.vlgmr.msrb.gmra.mxu0 %v2641_v16  ;;  %v1322_v16 = vld [vmem:[%s2620_s27] sm:$0xff] }
  0xd1   : > { %1288 = vmatmul.bf16.vlgmr.msrb.gmra.mxu1 %v2650_v33 }
  0xd2   : > { %1302 = vmatmul.bf16.vlgmr.msrb.gmra.mxu2 %v2636_v9 }
  0xd3   : > { %1316 = vmatmul.bf16.vlgmr.msrb.gmra.mxu3 %v2645_v20 }
  0xf1   : > { %v1107_v29 = vpop.f32.mrf.mxu0 }
  0xf2   : > { %v1108_v30 = vadd.f32 %v1107_v29, %v430_v28 }
  0xf5   : > { %v1135_v34 = vpop.f32.mrf.mxu2 }
  0xf6   : > { %v1121_v31 = vpop.f32.mrf.mxu1 }
  0xf7   : > { %v1122_v32 = vadd.f32 %v1121_v31, %v1108_v30 }
  0xf8   : > { %v1149_v36 = vpop.f32.mrf.mxu3 }
  0xf9   : > { %v1136_v35 = vadd.f32 %v1135_v34, %v1122_v32  ;;  %v1109_v33 = vpop.f32.mrf.mxu0 }
  0xfa   : > { %v1110_v38 = vadd.f32 %v1109_v33, %v430_v28  ;;  %v433_v28 = vperm.slane %v2666_v27, 3 }
  0xfb   : > { %v1150_v37 = vadd.f32 %v1149_v36, %v1136_v35 }
  0xfd   : > { %v1330_v9 = vmul.f32 %v1322_v16, %v1150_v37  ;;  %v1137_v40 = vpop.f32.mrf.mxu2  ;;  %v1325_v37 = vld [vmem:[%s2620_s27 + $0x18] sm:$0xff] }
  0xfe   : > { %v1123_v39 = vpop.f32.mrf.mxu1 }
  0xff   : > { %v1124_v20 = vadd.f32 %v1123_v39, %v1110_v38  ;;  %1338 = vst [vmem:[%s2672_s21] sm:$0xff] %v1330_v9 }
 0x100   : > { %v1151_v42 = vpop.f32.mrf.mxu3 }
 0x101   : > { %v1138_v41 = vadd.f32 %v1137_v40, %v1124_v20 }
 0x103   : > { %v1152_v44 = vadd.f32 %v1151_v42, %v1138_v41  ;;  %v1329_v42 = vld [vmem:[%s2620_s27 + $0x38] sm:$0xff] }
 0x105   : > { %v1334_v45 = vmul.f32 %v1326_v43, %v1152_v44 }
 0x107   : > { %1342 = vst [vmem:[%s2672_s21 + $0x20] sm:$0xff] %v1334_v45 }
 0x10d   : > { %v1163_v47 = vpop.f32.mrf.mxu0 }
 0x10e   : > { %v1164_v48 = vadd.f32 %v1163_v47, %v431_v46  ;;  %v1177_v49 = vpop.f32.mrf.mxu1 }
 0x110   : > { %v1178_v50 = vadd.f32 %v1177_v49, %v1164_v48 }
 0x115   : > { %v1191_v51 = vpop.f32.mrf.mxu2  ;;  %v1165_v56 = vpop.f32.mrf.mxu0 }
 0x116   : > { %v1192_v52 = vadd.f32 %v1191_v51, %v1178_v50  ;;  %v1205_v53 = vpop.f32.mrf.mxu3  ;;  %v1166_v57 = vadd.f32 %v1165_v56, %v431_v46  ;;  %v1179_v58 = vpop.f32.mrf.mxu1 }
 0x118   : > { %v1206_v55 = vadd.f32 %v1205_v53, %v1192_v52  ;;  %v1180_v60 = vadd.f32 %v1179_v58, %v1166_v57 }
 0x11a   : > { %v1331_v59 = vmul.f32 %v1323_v54, %v1206_v55 }
 0x11c   : > { %1339 = vst [vmem:[%s2672_s21 + $0x8] sm:$0xff] %v1331_v59 }
 0x11d   : > { %v1193_v61 = vpop.f32.mrf.mxu2 }
 0x11e   : > { %v1194_v62 = vadd.f32 %v1193_v61, %v1180_v60  ;;  %v1207_v63 = vpop.f32.mrf.mxu3 }
 0x120   : > { %v1208_v1 = vadd.f32 %v1207_v63, %v1194_v62 }
 0x122   : > { %v1335_v2 = vmul.f32 %v1327_v0, %v1208_v1 }
 0x124   : > { %1343 = vst [vmem:[%s2672_s21 + $0x28] sm:$0xff] %v1335_v2 }
 0x12d   : > { %v1219_v4 = vpop.f32.mrf.mxu0 }
 0x12e   : > { %v1220_v5 = vadd.f32 %v1219_v4, %v432_v3  ;;  %v1233_v6 = vpop.f32.mrf.mxu1 }
 0x130   : > { %v1234_v7 = vadd.f32 %v1233_v6, %v1220_v5 }
 0x135   : > { %v1247_v8 = vpop.f32.mrf.mxu2  ;;  %v1221_v14 = vpop.f32.mrf.mxu0 }
 0x136   : > { %v1248_v10 = vadd.f32 %v1247_v8, %v1234_v7  ;;  %v1261_v11 = vpop.f32.mrf.mxu3  ;;  %v1222_v15 = vadd.f32 %v1221_v14, %v432_v3  ;;  %v1235_v17 = vpop.f32.mrf.mxu1 }
 0x138   : > { %v1262_v13 = vadd.f32 %v1261_v11, %v1248_v10  ;;  %v1236_v19 = vadd.f32 %v1235_v17, %v1222_v15 }
 0x13a   : > { %v1332_v18 = vmul.f32 %v1324_v12, %v1262_v13 }
 0x13c   : > { %1340 = vst [vmem:[%s2672_s21 + $0x10] sm:$0xff] %v1332_v18 }
 0x13d   : > { %v1249_v21 = vpop.f32.mrf.mxu2 }
 0x13e   : > { %v1250_v22 = vadd.f32 %v1249_v21, %v1236_v19  ;;  %v1263_v23 = vpop.f32.mrf.mxu3 }
 0x140   : > { %v1264_v25 = vadd.f32 %v1263_v23, %v1250_v22 }
 0x142   : > { %v1336_v26 = vmul.f32 %v1328_v24, %v1264_v25 }
 0x144   : > { %1344 = vst [vmem:[%s2672_s21 + $0x30] sm:$0xff] %v1336_v26 }
 0x14d   : > { %v1275_v29 = vpop.f32.mrf.mxu0 }
 0x14e   : > { %v1276_v30 = vadd.f32 %v1275_v29, %v433_v28  ;;  %v1289_v31 = vpop.f32.mrf.mxu1 }
 0x150   : > { %v1290_v32 = vadd.f32 %v1289_v31, %v1276_v30 }
 0x155   : > { %v1303_v34 = vpop.f32.mrf.mxu2  ;;  %v1277_v16 = vpop.f32.mrf.mxu0 }
 0x156   : > { %v1304_v35 = vadd.f32 %v1303_v34, %v1290_v32  ;;  %v1317_v36 = vpop.f32.mrf.mxu3  ;;  %v1278_v38 = vadd.f32 %v1277_v16, %v433_v28  ;;  %v1291_v39 = vpop.f32.mrf.mxu1 }
 0x158   : > { %v1318_v33 = vadd.f32 %v1317_v36, %v1304_v35  ;;  %v1292_v27 = vadd.f32 %v1291_v39, %v1278_v38 }
 0x15a   : > { %v1333_v9 = vmul.f32 %v1325_v37, %v1318_v33 }
 0x15c   : > { %1341 = vst [vmem:[%s2672_s21 + $0x18] sm:$0xff] %v1333_v9 }
 0x15d   : > { %v1305_v20 = vpop.f32.mrf.mxu2 }
 0x15e   : > { %v1306_v40 = vadd.f32 %v1305_v20, %v1292_v27  ;;  %v1319_v41 = vpop.f32.mrf.mxu3 }
 0x160   : > { %v1320_v43 = vadd.f32 %v1319_v41, %v1306_v40 }
 0x162   : > { %v1337_v44 = vmul.f32 %v1329_v42, %v1320_v43 }
 0x164   : > { %1345 = vst [vmem:[%s2672_s21 + $0x38] sm:$0xff] %v1337_v44 }
 0x165   : > { %2394 = shalt.err (!%p2391_p9)
}
 0x166   : > { %s2453_s11 = smov 512   ;;  %s2454_s23 = smov 32  }
 0x167   : > { %2181 = dma.vmem_to_hbm [thread:$0]  (%p2549_p3), %s1361_s30, 1024, %s1363_s5, %s1347_s19, %s2453_s11, %s2453_s11, %s2454_s23  }
 0x168 PF: > { %s1377_s26 = sand.u32 1, %s2433_s15   ;;  %p2745_p12 = scmp.ge.s32.totalorder %s2445_s18, 2 }
 0x169   : > { %s1378_s8 = scalar_lea.sflag [#allocation4], %s1377_s26 }
 0x16a   : > { %p2198_p13 = pnand %p2745_p12, %p2515_p6 }
 0x16c   : > { %p2199_p0 = pneg %p2198_p13 }
 0x16e   : > { %2428 = dma.done.wait (%p2199_p0), %s1378_s8, 1024  }
 0x16f   : > { %2430 = vsyncadd (%p2199_p0), %s1378_s8, 4294966272  ;;  %s2746_s24 = sld [smem:[#allocation16_spill]]  ;;  %p21_p5 = scmp.ge.s32.totalorder %s2539_s10, 4  }
 0x170   : > { %s2747_s15 = smov %s2437_s16  ;;  %s2748_s16 = smov %s2441_s17 }
 0x171   : > { %s2750_s18 = smov %s2539_s10  ;;  %23 = sbr.rel (!%p21_p5) target bundleno = 11 (0xb), region = 102 }
 0x175   : > { %s2749_s17 = smov %s2746_s24 }
 0x176   :  { %1384 = vsyncpa [#allocation3], 1 }
 0x177   :  { %1386 = vsyncpa [#allocation3 + $0x1], 1 }
 0x178   :  { %1387 = vsyncpa [#allocation6], 1 }
 0x179   :  { %1389 = vsyncpa [#allocation6 + $0x1], 1 }
 0x17a   :  { %1390 = vsyncpa [#allocation9], 1 }
 0x17b   :  { %1391 = vsyncpa [#allocation4], 1 }
 0x17c   :  { %1393 = vsyncpa [#allocation4 + $0x1], 1 }

</bundles_post_ra>
